<compile_context>
chip_gen: v7x
topology: tpu7x:2x2x1
jax: 0.10.0
libtpu: 0.0.40
codegen_flags: <defaults>
</compile_context>

<pallas_src>
import math

import jax
import jax.numpy as jnp
from jax.experimental import pallas as pl
from jax.experimental.pallas import tpu as pltpu


# -----------------------------------------------------------------------------
# Kernel: out = x + pe, fully lane-dense elementwise add.
# -----------------------------------------------------------------------------
def _add_pe_kernel(x_ref, pe_ref, o_ref):
    # (rows, W*N*C) tiles; pure VPU elementwise, unmasked full-lane stores.
    o_ref[...] = (x_ref[...] + pe_ref[...]).astype(o_ref.dtype)


# -----------------------------------------------------------------------------
# Wrapper
# -----------------------------------------------------------------------------
def pe_forward(x, pe_buf, *, block_budget_bytes=4 * 1024 * 1024,
               vmem_limit_bytes=48 * 1024 * 1024):
    """out = x + pe (N-broadcast baked into pe_buf). Output Dropout = identity (eval)."""
    H, W, N, C = x.shape
    L = W * N * C
    assert pe_buf.shape == (H, L), (pe_buf.shape, (H, L))

    x2d = x.reshape(H, L)  # free contiguous collapse -> lane-dense 2D view

    # Pick the largest row tile whose (x + pe + out) block fits the budget.
    # Pallas double-buffers each operand, so worst case VMEM use is
    # ~2 * block_budget_bytes, well under the explicit limit below (v7x-safe).
    bytes_per_row = L * (2 * x2d.dtype.itemsize + pe_buf.dtype.itemsize)
    th = max(1, block_budget_bytes // bytes_per_row)
    if th >= H:
        th = H                                   # whole problem in one block
    else:
        th = min(H, max(8, (th // 8) * 8))       # keep sublane dim a multiple of 8

    grid = (pl.cdiv(H, th),)
    spec = pl.BlockSpec((th, L), lambda i: (i, 0))

    out2d = pl.pallas_call(
        _add_pe_kernel,
        out_shape=jax.ShapeDtypeStruct((H, L), x.dtype),
        grid_spec=pltpu.PrefetchScalarGridSpec(
            num_scalar_prefetch=0,
            grid=grid,
            in_specs=[spec, spec],
            out_specs=spec,
        ),
        compiler_params=pltpu.CompilerParams(
            dimension_semantics=("parallel",),
            vmem_limit_bytes=vmem_limit_bytes,
        ),
    )(x2d, pe_buf)

    return out2d.reshape(H, W, N, C)


# -----------------------------------------------------------------------------
# Buffers / parameters (deterministic, synthetic) — mirror the PyTorch module.
# -----------------------------------------------------------------------------
def make_raw_pe(H, W, C):
    """The module's __init__ `pe` buffer (raw pos*div values, before sin/cos): (H, W, C)."""
    d = C // 2
    pos_h = jnp.arange(H, dtype=jnp.float32)[:, None]
    pos_w = jnp.arange(W, dtype=jnp.float32)[:, None]
    div = jnp.exp(jnp.arange(0, d, 2, dtype=jnp.float32) * (-math.log(10000.0) / d))
    ww = pos_w * div                                  # (W, d//2)
    hh = pos_h * div                                  # (H, d//2)
    pe = jnp.zeros((H, W, C), jnp.float32)
    pe = pe.at[:, :, 0:d:2].set(jnp.broadcast_to(ww[None, :, :], (H, W, ww.shape[1])))
    pe = pe.at[:, :, 1:d:2].set(jnp.broadcast_to(ww[None, :, :], (H, W, ww.shape[1])))
    pe = pe.at[:, :, d::2].set(jnp.broadcast_to(hh[:, None, :], (H, W, hh.shape[1])))
    pe = pe.at[:, :, d + 1::2].set(jnp.broadcast_to(hh[:, None, :], (H, W, hh.shape[1])))
    return pe


def make_pe_buffer(H, W, N, C):
    """Effective sin/cos PE the forward adds, pre-broadcast over N and flattened to
    the lane-dense (H, W*N*C) layout streamed by the kernel (computed once)."""
    raw = make_raw_pe(H, W, C)
    d = C // 2
    pe = jnp.zeros_like(raw)
    pe = pe.at[:, :, 0:d:2].set(jnp.sin(raw[:, :, 0:d:2]))
    pe = pe.at[:, :, 1:d:2].set(jnp.cos(raw[:, :, 1:d:2]))
    pe = pe.at[:, :, d::2].set(jnp.sin(raw[:, :, d::2]))
    pe = pe.at[:, :, d + 1::2].set(jnp.cos(raw[:, :, d + 1::2]))
    pe = jnp.broadcast_to(pe[:, :, None, :], (H, W, N, C))
    return pe.reshape(H, W * N * C)


def init_params(key, C):
    """linear_alpha: Linear(C, C//2) -> ReLU -> Dropout -> Linear(C//2, C) -> Sigmoid.
    Only used by the faithful reference (its output is dead code in the forward)."""
    k1, k2, k3, k4 = jax.random.split(key, 4)
    s1 = 1.0 / math.sqrt(C)
    s2 = 1.0 / math.sqrt(C // 2)
    w1 = jax.random.uniform(k1, (C, C // 2), jnp.float32, -s1, s1)
    b1 = jax.random.uniform(k2, (C // 2,), jnp.float32, -s1, s1)
    w2 = jax.random.uniform(k3, (C // 2, C), jnp.float32, -s2, s2)
    b2 = jax.random.uniform(k4, (C,), jnp.float32, -s2, s2)
    return w1, b1, w2, b2


def ref_forward(x, params, raw_pe):
    """Line-by-line pure-JAX port of ExperimentalPositionalEncoding.forward (eval mode).
    The linear_alpha branch is computed exactly as in the module and — exactly as in
    the module — its result is fully overwritten by the slice assignments below."""
    H, W, N, C = x.shape
    d = C // 2
    w1, b1, w2, b2 = params
    hid = jnp.maximum(x.reshape(-1, N, C).mean(axis=0) @ w1 + b1, 0.0)   # Dropout: identity
    alpha = jax.nn.sigmoid(hid @ w2 + b2).reshape(1, 1, N, C)
    src = raw_pe[:, :, None, :]                     # self.pe[:H, :W, :, :]
    pe = alpha * src                                # (H, W, N, C)

    def _set(pe, lo, hi, step, fn):
        sl = slice(lo, hi, step)
        val = jnp.broadcast_to(fn(src[:, :, :, sl]), pe[:, :, :, sl].shape)
        return pe.at[:, :, :, sl].set(val)

    pe = _set(pe, 0, d, 2, jnp.sin)
    pe = _set(pe, 1, d, 2, jnp.cos)
    pe = _set(pe, d, None, 2, jnp.sin)
    pe = _set(pe, d + 1, None, 2, jnp.cos)
    return x + pe                                   # output Dropout: identity (eval)


if __name__ == "__main__":
    H, W, N, C = 16, 16, 2, 32
    key = jax.random.PRNGKey(0)
    kx, kp = jax.random.split(key)

    x = jax.random.normal(kx, (H, W, N, C), jnp.float32)
    params = init_params(kp, C)           # used only by the faithful reference
    pe_buf = make_pe_buffer(H, W, N, C)   # one-time constant (module's buffer analogue)

    out = pe_forward(x, pe_buf)
    out = jax.block_until_ready(out)

    ref = ref_forward(x, params, make_raw_pe(H, W, C))
    assert out.shape == (H, W, N, C)
    assert jnp.allclose(out, ref, atol=1e-5, rtol=1e-5), "mismatch vs PyTorch-faithful reference"

    print("KERNEL_OK")
</pallas_src>

<mosaic_0001>
module attributes {stable_mosaic.version = 11 : i64} {
  func.func @_add_pe_kernel(%arg0: i32, %arg1: memref<16x1024xf32, #tpu.memory_space<vmem>>, %arg2: memref<16x1024xf32, #tpu.memory_space<vmem>>, %arg3: memref<16x1024xf32, #tpu.memory_space<vmem>>) attributes {dimension_semantics = [#tpu.dimension_semantics<parallel>], iteration_bounds = array<i64: 1>, scalar_prefetch = 0 : i64, scratch_operands = 0 : i64, tpu.core_type = #tpu.core_type<tc>, window_params = [{transform_indices = @transform_0, window_bounds = array<i64: 16, 1024>}, {transform_indices = @transform_1, window_bounds = array<i64: 16, 1024>}, {transform_indices = @transform_2, window_bounds = array<i64: 16, 1024>}]} {
    %c0 = arith.constant 0 : index
    %c0_0 = arith.constant 0 : index
    %0 = vector.load %arg1[%c0, %c0_0] : memref<16x1024xf32, #tpu.memory_space<vmem>>, vector<16x1024xf32>
    %c0_1 = arith.constant 0 : index
    %c0_2 = arith.constant 0 : index
    %1 = vector.load %arg2[%c0_1, %c0_2] : memref<16x1024xf32, #tpu.memory_space<vmem>>, vector<16x1024xf32>
    %2 = arith.addf %0, %1 : vector<16x1024xf32>
    %c0_3 = arith.constant 0 : index
    %c0_4 = arith.constant 0 : index
    %3 = vector.load %arg3[%c0_3, %c0_4] : memref<16x1024xf32, #tpu.memory_space<vmem>>, vector<16x1024xf32>
    tpu.vector_store %arg3[%c0_3, %c0_4], %2 {strides = array<i32>} : memref<16x1024xf32, #tpu.memory_space<vmem>>, vector<16x1024xf32>,
    return
  }
  func.func @transform_0(%arg0: i32) -> (i32, i32) {
    %c0_i32 = arith.constant 0 : i32
    %c0_i32_0 = arith.constant 0 : i32
    return %arg0, %c0_i32 : i32, i32
  }
  func.func @transform_1(%arg0: i32) -> (i32, i32) {
    %c0_i32 = arith.constant 0 : i32
    %c0_i32_0 = arith.constant 0 : i32
    return %arg0, %c0_i32 : i32, i32
  }
  func.func @transform_2(%arg0: i32) -> (i32, i32) {
    %c0_i32 = arith.constant 0 : i32
    %c0_i32_0 = arith.constant 0 : i32
    return %arg0, %c0_i32 : i32, i32
  }
}

</mosaic_0001>

<bundles_post_ra>
// kernel: tpu_custom_call.1
= control target key start
LH: loop header
LB: loop body
LE: loop exit
PB: predicated region body
PF: predicated region fallthrough
CT: control target
= control target key end

     0   :  { %7 = vsyncpa [#allocation3], 0  ;;  %s264_s0 = inlined_call_operand.hbm [shape: f32[16,1024], index: 0, kind: input, shape index: {}]   ;;  %s265_s1 = inlined_call_operand.hbm [shape: f32[16,1024], index: 1, kind: input, shape index: {}]   ;;  %s266_s2 = inlined_call_operand.hbm [shape: f32[16,1024], index: 2, kind: output, shape index: {}]  }
   0x1   :  { %8 = vsyncpa [#allocation6], 0 }
   0x2   :  { %9 = vsyncpa [#allocation4], 0  ;;  %s199_s9 = smov [#allocation2]   ;;  %s127_s13 = scalar_lea.hbm %s264_s0, 2048 }
   0x3   :  { %s15_s10 = sshll.u32 %s199_s9, 4  ;;  %p128_p0 = scmp.ne.s32.totalorder %s264_s0, %s127_s13  ;;  %s16_s10 = int_to_ptr.vmem [resolvable:$true] %s15_s10 }
   0x4   :  { %p131_p1 = scmp.lt.u32.totalorder %s127_s13, %s264_s0 }
   0x6   :  { %p133_p2 = pnand %p131_p1, %p128_p0 }
   0x8   :  { %136 = shalt.err (!%p133_p2)
}
   0x9   :  { %s137_s18 = scalar_lea.vmem %s16_s10, 2048  ;;  %p142_p4 = scmp.lt.s32.totalorder %s16_s10, %s16_s10 }
   0xa   :  { %p138_p3 = scmp.ne.s32.totalorder %s16_s10, %s137_s18  ;;  %p143_p5 = scmp.lt.s32.totalorder %s137_s18, %s137_s18 }
   0xc   :  { %p144_p6 = por %p143_p5, %p142_p4 }
   0xe   :  { %p145_p7 = pnand %p144_p6, %p138_p3 }
  0x10   :  { %148 = shalt.err (!%p145_p7)
}
  0x11   :  { %s200_s19 = smov 1024   ;;  %s201_s20 = smov 64  }
  0x12   :  { %21 = dma.hbm_to_vmem [thread:$0]  %s264_s0, 2048, %s16_s10, [#allocation3], %s200_s19, %s200_s19, %s201_s20  }
  0x13   :  { %s202_s23 = smov [#allocation5]   ;;  %s149_s27 = scalar_lea.hbm %s265_s1, 2048 }
  0x14   :  { %s27_s24 = sshll.u32 %s202_s23, 4  ;;  %p150_p8 = scmp.ne.s32.totalorder %s265_s1, %s149_s27  ;;  %s28_s24 = int_to_ptr.vmem [resolvable:$true] %s27_s24 }
  0x15   :  { %p153_p9 = scmp.lt.u32.totalorder %s149_s27, %s265_s1 }
  0x17   :  { %p155_p10 = pnand %p153_p9, %p150_p8 }
  0x19   :  { %158 = shalt.err (!%p155_p10)
}
  0x1a   :  { %s159_s4 = scalar_lea.vmem %s28_s24, 2048  ;;  %p164_p12 = scmp.lt.s32.totalorder %s28_s24, %s28_s24 }
  0x1b   :  { %p160_p11 = scmp.ne.s32.totalorder %s28_s24, %s159_s4  ;;  %p165_p13 = scmp.lt.s32.totalorder %s159_s4, %s159_s4 }
  0x1d   :  { %p166_p0 = por %p165_p13, %p164_p12 }
  0x1f   :  { %p167_p1 = pnand %p166_p0, %p160_p11 }
  0x21   :  { %170 = shalt.err (!%p167_p1)
}
  0x22   :  { %33 = dma.hbm_to_vmem [thread:$0]  %s265_s1, 2048, %s28_s24, [#allocation6], %s200_s19, %s200_s19, %s201_s20  }
  0x23   :  { %193 = dma.done.wait [#allocation3], 2048  }
  0x24   :  { %194 = vsyncadd [#allocation3], 4294965248 }
  0x25   :  { %195 = dma.done.wait [#allocation6], 2048  }
  0x26   :  { %196 = vsyncadd [#allocation6], 4294965248  ;;  %v40_v0 = vld [vmem:[#allocation2] sm:$0xff]  ;;  %v41_v2 = vld [vmem:[#allocation2 + $0x8] sm:$0xff]  ;;  %s203_s1 = smov [#allocation7]  }
  0x27   :  { %v56_v1 = vld [vmem:[#allocation5] sm:$0xff]  ;;  %v57_v4 = vld [vmem:[#allocation5 + $0x8] sm:$0xff]  ;;  %v42_v5 = vld [vmem:[#allocation2 + $0x10] sm:$0xff]  ;;  %s109_s6 = sshll.u32 %s203_s1, 4  ;;  %s110_s6 = int_to_ptr.vmem [resolvable:$true] %s109_s6 }
  0x28   :  { %v72_v3 = vadd.f32 %v56_v1, %v40_v0  ;;  %v58_v6 = vld [vmem:[#allocation5 + $0x10] sm:$0xff]  ;;  %v73_v7 = vadd.f32 %v57_v4, %v41_v2  ;;  %v43_v9 = vld [vmem:[#allocation2 + $0x18] sm:$0xff]  ;;  %v44_v11 = vld [vmem:[#allocation2 + $0x20] sm:$0xff]  ;;  %s171_s7 = scalar_lea.vmem %s110_s6, 2048  ;;  %p176_p3 = scmp.lt.s32.totalorder %s110_s6, %s110_s6 }
  0x29   :  { %v74_v8 = vadd.f32 %v58_v6, %v42_v5  ;;  %v59_v10 = vld [vmem:[#allocation5 + $0x18] sm:$0xff]  ;;  %v60_v13 = vld [vmem:[#allocation5 + $0x20] sm:$0xff]  ;;  %v45_v14 = vld [vmem:[#allocation2 + $0x28] sm:$0xff]  ;;  %p172_p2 = scmp.ne.s32.totalorder %s110_s6, %s171_s7  ;;  %p177_p4 = scmp.lt.s32.totalorder %s171_s7, %s171_s7 }
  0x2a   :  { %88 = vst [vmem:[#allocation7] sm:$0xff] %v72_v3  ;;  %v75_v12 = vadd.f32 %v59_v10, %v43_v9  ;;  %v61_v15 = vld [vmem:[#allocation5 + $0x28] sm:$0xff]  ;;  %89 = vst [vmem:[#allocation7 + $0x8] sm:$0xff] %v73_v7  ;;  %v76_v16 = vadd.f32 %v60_v13, %v44_v11  ;;  %v46_v18 = vld [vmem:[#allocation2 + $0x30] sm:$0xff] }
  0x2b   :  { %90 = vst [vmem:[#allocation7 + $0x10] sm:$0xff] %v74_v8  ;;  %v77_v17 = vadd.f32 %v61_v15, %v45_v14  ;;  %v62_v19 = vld [vmem:[#allocation5 + $0x30] sm:$0xff]  ;;  %v47_v20 = vld [vmem:[#allocation2 + $0x38] sm:$0xff]  ;;  %v48_v23 = vld [vmem:[#allocation2 + $0x40] sm:$0xff]  ;;  %p178_p5 = por %p177_p4, %p176_p3 }
  0x2c   :  { %91 = vst [vmem:[#allocation7 + $0x18] sm:$0xff] %v75_v12  ;;  %v78_v21 = vadd.f32 %v62_v19, %v46_v18  ;;  %v63_v22 = vld [vmem:[#allocation5 + $0x38] sm:$0xff]  ;;  %v64_v24 = vld [vmem:[#allocation5 + $0x40] sm:$0xff]  ;;  %92 = vst [vmem:[#allocation7 + $0x20] sm:$0xff] %v76_v16 }
  0x2d   :  { %93 = vst [vmem:[#allocation7 + $0x28] sm:$0xff] %v77_v17  ;;  %v79_v25 = vadd.f32 %v63_v22, %v47_v20  ;;  %v80_v26 = vadd.f32 %v64_v24, %v48_v23  ;;  %v49_v27 = vld [vmem:[#allocation2 + $0x48] sm:$0xff]  ;;  %v50_v29 = vld [vmem:[#allocation2 + $0x50] sm:$0xff]  ;;  %v51_v32 = vld [vmem:[#allocation2 + $0x58] sm:$0xff]  ;;  %p179_p6 = pnand %p178_p5, %p172_p2 }
  0x2e   :  { %v65_v28 = vld [vmem:[#allocation5 + $0x48] sm:$0xff]  ;;  %94 = vst [vmem:[#allocation7 + $0x30] sm:$0xff] %v78_v21  ;;  %v66_v31 = vld [vmem:[#allocation5 + $0x50] sm:$0xff]  ;;  %v67_v33 = vld [vmem:[#allocation5 + $0x58] sm:$0xff] }
  0x2f   :  { %v81_v30 = vadd.f32 %v65_v28, %v49_v27  ;;  %95 = vst [vmem:[#allocation7 + $0x38] sm:$0xff] %v79_v25  ;;  %96 = vst [vmem:[#allocation7 + $0x40] sm:$0xff] %v80_v26  ;;  %v82_v34 = vadd.f32 %v66_v31, %v50_v29  ;;  %v83_v35 = vadd.f32 %v67_v33, %v51_v32  ;;  %v52_v36 = vld [vmem:[#allocation2 + $0x60] sm:$0xff]  ;;  %v53_v38 = vld [vmem:[#allocation2 + $0x68] sm:$0xff] }
  0x30   :  { %v68_v37 = vld [vmem:[#allocation5 + $0x60] sm:$0xff]  ;;  %v69_v40 = vld [vmem:[#allocation5 + $0x68] sm:$0xff]  ;;  %v54_v41 = vld [vmem:[#allocation2 + $0x70] sm:$0xff] }
  0x31   :  { %97 = vst [vmem:[#allocation7 + $0x48] sm:$0xff] %v81_v30  ;;  %v84_v39 = vadd.f32 %v68_v37, %v52_v36  ;;  %v70_v42 = vld [vmem:[#allocation5 + $0x70] sm:$0xff]  ;;  %98 = vst [vmem:[#allocation7 + $0x50] sm:$0xff] %v82_v34  ;;  %v85_v43 = vadd.f32 %v69_v40, %v53_v38  ;;  %v55_v45 = vld [vmem:[#allocation2 + $0x78] sm:$0xff] }
  0x32   :  { %99 = vst [vmem:[#allocation7 + $0x58] sm:$0xff] %v83_v35  ;;  %v86_v44 = vadd.f32 %v70_v42, %v54_v41  ;;  %v71_v46 = vld [vmem:[#allocation5 + $0x78] sm:$0xff] }
  0x33   :  { %100 = vst [vmem:[#allocation7 + $0x60] sm:$0xff] %v84_v39  ;;  %v87_v47 = vadd.f32 %v71_v46, %v55_v45  ;;  %101 = vst [vmem:[#allocation7 + $0x68] sm:$0xff] %v85_v43 }
  0x34   :  { %102 = vst [vmem:[#allocation7 + $0x70] sm:$0xff] %v86_v44 }
  0x35   :  { %103 = vst [vmem:[#allocation7 + $0x78] sm:$0xff] %v87_v47 }
  0x36   :  { %182 = shalt.err (!%p179_p6)
}
  0x37   :  { %s183_s10 = scalar_lea.hbm %s266_s2, 2048 }
  0x38   :  { %p184_p7 = scmp.ne.s32.totalorder %s266_s2, %s183_s10  ;;  %p187_p8 = scmp.lt.u32.totalorder %s183_s10, %s266_s2 }
  0x3a   :  { %p189_p9 = pnand %p187_p8, %p184_p7 }
  0x3c   :  { %192 = shalt.err (!%p189_p9)
}
  0x3d   :  { %115 = dma.vmem_to_hbm [thread:$0]  %s110_s6, 2048, %s266_s2, [#allocation4], %s200_s19, %s200_s19, %s201_s20  }
  0x3e   :  { %197 = dma.done.wait [#allocation4], 2048  }
  0x3f   :  { %198 = vsyncadd [#allocation4], 4294965248 }
  0x40   :  { %119 = vsyncpa [#allocation3], 1 }
  0x41   :  { %120 = vsyncpa [#allocation6], 1 }
  0x42   :  { %121 = vsyncpa [#allocation4], 1 }

</bundles_post_ra>
